<compile_context>
chip_gen: v6e
topology: v6e:2x2x1
jax: 0.10.0
libtpu: 0.0.40
codegen_flags: <defaults>
</compile_context>

<pallas_src>
import functools

import jax
import jax.numpy as jnp
from jax import lax
from jax.experimental import pallas as pl
from jax.experimental.pallas import tpu as pltpu

LANES = 128
SUBLANES = 8
MAX_BLOCK_ROWS = 4096   # (4096, 128) f32 = 2 MiB / input / buffer


def _row_alignment(*dtypes):
    """Sublane alignment so (block_rows, 128) blocks are native for the
    narrowest streamed dtype: f32 -> 8, bf16/f16 -> 16, int8/fp8 -> 32."""
    min_itemsize = min(jnp.dtype(d).itemsize for d in dtypes)
    return {4: 8, 2: 16, 1: 32}.get(min_itemsize, 8)


def _bce_sum_kernel(pred_ref, y_ref, acc_ref, *, n_valid, block_rows, needs_mask):
    """Accumulate sum(y*log(p) + (1-y)*log(1-p)) into a resident (8,128) block."""
    i = pl.program_id(0)  # reduction axis ("arbitrary"); acc block stays resident

    @pl.when(i == 0)
    def _():
        acc_ref[...] = jnp.zeros_like(acc_ref)

    # Cast the streamed tile (native dtype) to f32 here, not in the wrapper.
    p = pred_ref[...].astype(jnp.float32)
    y = y_ref[...].astype(jnp.float32)

    # PyTorch BCELoss clamps each log term at -100 (avoids -inf at p in {0,1}).
    # TODO(synk): for guaranteed-binary labels a single log per element
    # (q = where(y > 0.5, p, 1 - p)) would halve EUP pushes on v7x.
    log_p = jnp.maximum(jnp.log(p), jnp.float32(-100.0))
    log_1mp = jnp.maximum(jnp.log(1.0 - p), jnp.float32(-100.0))
    # y*log_p + (1-y)*log_1mp  ==  log_1mp + y*(log_p - log_1mp)
    s = log_1mp + y * (log_p - log_1mp)

    if needs_mask:
        # Zero out positions past the true element count (ragged final block /
        # oversized block).  Out-of-range tile contents are unspecified, but
        # jnp.where selects 0 there regardless (no NaN propagation).
        row = lax.broadcasted_iota(jnp.int32, (block_rows, LANES), 0)
        col = lax.broadcasted_iota(jnp.int32, (block_rows, LANES), 1)
        gidx = (i * block_rows + row) * LANES + col
        s = jnp.where(gidx < n_valid, s, jnp.float32(0.0))

    # Tile-aligned reshape + leading-axis sum = pure VPU vreg adds per step;
    # no per-step cross-lane (XLU) reduce.
    acc_ref[...] += jnp.sum(s.reshape(-1, SUBLANES, LANES), axis=0)


def two_phase_loss(pred, y, phase=1, W_dynamic=1.0):
    """Equivalent of twoPhaseLoss(phase, W_dynamic)(pred, y).

    Both phases reduce to staticLoss = BCELoss(reduction='mean'); dynamicLoss
    returns 0, so phase / W_dynamic are intentionally ignored (kept for API
    parity with the PyTorch module).
    """
    del phase, W_dynamic
    assert pred.shape == y.shape
    n = int(pred.size)
    assert n > 0
    # int32 in-kernel global indexing; fine for any realistic tensor size.
    assert n < 2**31

    # Keep native dtypes end-to-end; ravel/reshape of a contiguous array is a
    # free bitcast in XLA (no HBM round-trip).
    pred_flat = jnp.ravel(pred)
    y_flat = jnp.ravel(y)

    rows = pl.cdiv(n, LANES)
    tail = rows * LANES - n
    if tail:
        # Rare path (n not a multiple of 128): pad the flat view to a full
        # lane row.  Padded values are irrelevant — masked out in-kernel.
        pred_flat = jnp.pad(pred_flat, (0, tail))
        y_flat = jnp.pad(y_flat, (0, tail))

    pred2d = pred_flat.reshape(rows, LANES)
    y2d = y_flat.reshape(rows, LANES)

    align = _row_alignment(pred.dtype, y.dtype)
    block_rows = min(MAX_BLOCK_ROWS, ((rows + align - 1) // align) * align)
    num_blocks = pl.cdiv(rows, block_rows)
    needs_mask = (num_blocks * block_rows * LANES) != n

    kernel = functools.partial(
        _bce_sum_kernel, n_valid=n, block_rows=block_rows, needs_mask=needs_mask)

    cost = pl.CostEstimate(
        flops=8 * n,
        transcendentals=2 * n,
        bytes_accessed=int(pred2d.size * pred2d.dtype.itemsize
                           + y2d.size * y2d.dtype.itemsize
                           + SUBLANES * LANES * 4),
    )

    partial = pl.pallas_call(
        kernel,
        out_shape=jax.ShapeDtypeStruct((SUBLANES, LANES), jnp.float32),
        grid_spec=pltpu.PrefetchScalarGridSpec(
            num_scalar_prefetch=0,
            grid=(num_blocks,),
            in_specs=[
                pl.BlockSpec((block_rows, LANES), lambda i: (i, 0)),
                pl.BlockSpec((block_rows, LANES), lambda i: (i, 0)),
            ],
            # Same output block for every grid step -> resident accumulator.
            out_specs=pl.BlockSpec((SUBLANES, LANES), lambda i: (0, 0)),
        ),
        compiler_params=pltpu.CompilerParams(
            dimension_semantics=("arbitrary",),
        ),
        cost_estimate=cost,
    )(pred2d, y2d)

    # BCE mean = -(sum of log terms) / n ; single tiny cross-lane reduce here.
    # NOTE: f32 sequential accumulation drifts ~1e-5 rel. only for n >= ~1e8.
    return -jnp.sum(partial) / jnp.float32(n)


def _reference_bce_mean(pred, y):
    p = pred.astype(jnp.float32)
    t = y.astype(jnp.float32)
    log_p = jnp.maximum(jnp.log(p), -100.0)
    log_1mp = jnp.maximum(jnp.log(1.0 - p), -100.0)
    return jnp.mean(-(t * log_p + (1.0 - t) * log_1mp))


if __name__ == "__main__":
    key = jax.random.PRNGKey(0)
    k1, k2 = jax.random.split(key)

    # Small NCHW shape consistent with a per-frame prediction map.
    shape = (2, 4, 16, 16)
    pred = jax.random.uniform(k1, shape, dtype=jnp.float32,
                              minval=1e-4, maxval=1.0 - 1e-4)
    y = (jax.random.uniform(k2, shape, dtype=jnp.float32) > 0.5).astype(jnp.float32)

    loss = two_phase_loss(pred, y, phase=1, W_dynamic=1.0)
    loss = jax.block_until_ready(loss)

    ref = _reference_bce_mean(pred, y)
    assert jnp.allclose(loss, ref, rtol=1e-5, atol=1e-5), (loss, ref)

    print("KERNEL_OK")
</pallas_src>

<mosaic_0001>
module attributes {stable_mosaic.version = 11 : i64} {
  func.func @_bce_sum_kernel(%arg0: i32, %arg1: memref<16x128xf32, #tpu.memory_space<vmem>>, %arg2: memref<16x128xf32, #tpu.memory_space<vmem>>, %arg3: memref<8x128xf32, #tpu.memory_space<vmem>>) attributes {dimension_semantics = [#tpu.dimension_semantics<arbitrary>], iteration_bounds = array<i64: 1>, scalar_prefetch = 0 : i64, scratch_operands = 0 : i64, tpu.core_type = #tpu.core_type<tc>, window_params = [{transform_indices = @transform_0, window_bounds = array<i64: 16, 128>}, {transform_indices = @transform_1, window_bounds = array<i64: 16, 128>}, {pipeline_mode = #tpu.pipeline_mode<synchronous>, transform_indices = @transform_2, window_bounds = array<i64: 8, 128>}]} {
    %c0_i32 = arith.constant 0 : i32
    %0 = arith.cmpi eq, %arg0, %c0_i32 : i32
    %1 = arith.extui %0 : i1 to i32
    %c0_i32_0 = arith.constant 0 : i32
    %2 = arith.cmpi ne, %1, %c0_i32_0 : i32
    scf.if %2 {
      %cst_11 = arith.constant 0.000000e+00 : f32
      %21 = vector.broadcast %cst_11 : f32 to vector<8x128xf32>
      %c0_12 = arith.constant 0 : index
      %c0_13 = arith.constant 0 : index
      %22 = vector.load %arg3[%c0_12, %c0_13] : memref<8x128xf32, #tpu.memory_space<vmem>>, vector<8x128xf32>
      tpu.vector_store %arg3[%c0_12, %c0_13], %21 {strides = array<i32>} : memref<8x128xf32, #tpu.memory_space<vmem>>, vector<8x128xf32>,
    } else {
    }
    %c0 = arith.constant 0 : index
    %c0_1 = arith.constant 0 : index
    %3 = vector.load %arg1[%c0, %c0_1] : memref<16x128xf32, #tpu.memory_space<vmem>>, vector<16x128xf32>
    %c0_2 = arith.constant 0 : index
    %c0_3 = arith.constant 0 : index
    %4 = vector.load %arg2[%c0_2, %c0_3] : memref<16x128xf32, #tpu.memory_space<vmem>>, vector<16x128xf32>
    %5 = math.log %3 : vector<16x128xf32>
    %cst = arith.constant -1.000000e+02 : f32
    %6 = vector.broadcast %cst : f32 to vector<16x128xf32>
    %7 = arith.maximumf %5, %6 : vector<16x128xf32>
    %cst_4 = arith.constant 1.000000e+00 : f32
    %8 = vector.broadcast %cst_4 : f32 to vector<16x128xf32>
    %9 = arith.subf %8, %3 : vector<16x128xf32>
    %10 = math.log %9 : vector<16x128xf32>
    %cst_5 = arith.constant -1.000000e+02 : f32
    %11 = vector.broadcast %cst_5 : f32 to vector<16x128xf32>
    %12 = arith.maximumf %10, %11 : vector<16x128xf32>
    %13 = arith.subf %7, %12 : vector<16x128xf32>
    %14 = arith.mulf %4, %13 : vector<16x128xf32>
    %15 = arith.addf %12, %14 : vector<16x128xf32>
    %c0_6 = arith.constant 0 : index
    %c0_7 = arith.constant 0 : index
    %16 = vector.load %arg3[%c0_6, %c0_7] : memref<8x128xf32, #tpu.memory_space<vmem>>, vector<8x128xf32>
    %17 = vector.shape_cast %15 : vector<16x128xf32> to vector<2x8x128xf32>
    %cst_8 = arith.constant dense<0.000000e+00> : vector<8x128xf32>
    %18 = vector.multi_reduction <add>, %17, %cst_8 [0] : vector<2x8x128xf32> to vector<8x128xf32>
    %19 = arith.addf %16, %18 : vector<8x128xf32>
    %c0_9 = arith.constant 0 : index
    %c0_10 = arith.constant 0 : index
    %20 = vector.load %arg3[%c0_9, %c0_10] : memref<8x128xf32, #tpu.memory_space<vmem>>, vector<8x128xf32>
    tpu.vector_store %arg3[%c0_9, %c0_10], %19 {strides = array<i32>} : memref<8x128xf32, #tpu.memory_space<vmem>>, vector<8x128xf32>,
    return
  }
  func.func @transform_0(%arg0: i32) -> (i32, i32) {
    %c0_i32 = arith.constant 0 : i32
    %c0_i32_0 = arith.constant 0 : i32
    return %arg0, %c0_i32 : i32, i32
  }
  func.func @transform_1(%arg0: i32) -> (i32, i32) {
    %c0_i32 = arith.constant 0 : i32
    %c0_i32_0 = arith.constant 0 : i32
    return %arg0, %c0_i32 : i32, i32
  }
  func.func @transform_2(%arg0: i32) -> (i32, i32) {
    %c0_i32 = arith.constant 0 : i32
    %c0_i32_0 = arith.constant 0 : i32
    %c0_i32_1 = arith.constant 0 : i32
    return %c0_i32, %c0_i32_0 : i32, i32
  }
}

</mosaic_0001>

<bundles_post_ra>
// kernel: tpu_custom_call.1
= control target key start
LH: loop header
LB: loop body
LE: loop exit
PB: predicated region body
PF: predicated region fallthrough
CT: control target
= control target key end

     0   :  { %7 = vsyncpa [#allocation3], 0  ;;  %s198_s0 = inlined_call_operand.hbm [shape: f32[16,128], index: 0, kind: input, shape index: {}]   ;;  %s199_s1 = inlined_call_operand.hbm [shape: f32[16,128], index: 1, kind: input, shape index: {}]   ;;  %s200_s2 = inlined_call_operand.hbm [shape: f32[8,128], index: 2, kind: output, shape index: {}]  }
   0x1   :  { %8 = vsyncpa [#allocation6], 0 }
   0x2   :  { %9 = vsyncpa [#allocation4], 0  ;;  %s169_s9 = smov [#allocation2]  }
   0x3   :  { %s15_s10 = sshll.u32 %s169_s9, 4  ;;  %s16_s10 = int_to_ptr.vmem [resolvable:$true] %s15_s10 }
   0x4   :  { %s111_s11 = scalar_lea.vmem %s16_s10, 256  ;;  %p116_p1 = scmp.lt.s32.totalorder %s16_s10, %s16_s10 }
   0x5   :  { %p112_p0 = scmp.ne.s32.totalorder %s16_s10, %s111_s11  ;;  %p117_p2 = scmp.lt.s32.totalorder %s111_s11, %s111_s11 }
   0x7   :  { %p118_p3 = por %p117_p2, %p116_p1 }
   0x9   :  { %p119_p4 = pnand %p118_p3, %p112_p0 }
   0xb   :  { %122 = shalt.err (!%p119_p4)
}
   0xc   :  { %s170_s12 = smov 128   ;;  %s171_s13 = smov 8  }
   0xd   :  { %21 = dma.hbm_to_vmem [thread:$0]  %s198_s0, 256, %s16_s10, [#allocation3], %s170_s12, %s170_s12, %s171_s13  }
   0xe   :  { %s172_s16 = smov [#allocation5]  }
   0xf   :  { %s27_s17 = sshll.u32 %s172_s16, 4  ;;  %s28_s17 = int_to_ptr.vmem [resolvable:$true] %s27_s17 }
  0x10   :  { %s131_s18 = scalar_lea.vmem %s28_s17, 256  ;;  %p136_p6 = scmp.lt.s32.totalorder %s28_s17, %s28_s17 }
  0x11   :  { %p132_p5 = scmp.ne.s32.totalorder %s28_s17, %s131_s18  ;;  %p137_p7 = scmp.lt.s32.totalorder %s131_s18, %s131_s18 }
  0x13   :  { %p138_p8 = por %p137_p7, %p136_p6 }
  0x15   :  { %p139_p9 = pnand %p138_p8, %p132_p5 }
  0x17   :  { %142 = shalt.err (!%p139_p9)
}
  0x18   :  { %33 = dma.hbm_to_vmem [thread:$0]  %s199_s1, 256, %s28_s17, [#allocation6], %s170_s12, %s170_s12, %s171_s13  }
  0x19   :  { %163 = dma.done.wait [#allocation3], 256  }
  0x1a   :  { %164 = vsyncadd [#allocation3], 4294967040 }
  0x1b   :  { %165 = dma.done.wait [#allocation6], 256  }
  0x1c   :  { %166 = vsyncadd [#allocation6], 4294967040  ;;  %v45_v0 = vld [vmem:[#allocation2] sm:$0xff]  ;;  %v46_v1 = vld [vmem:[#allocation2 + $0x8] sm:$0xff]  ;;  %s173_s0 = smov [#allocation7]  }
  0x1d   :  { %95 = vlog2.f32 %v45_v0  ;;  %v55_v2 = vsub.f32 1.0, %v45_v0  ;;  %v56_v3 = vsub.f32 1.0, %v46_v1  ;;  %v47_v15 = vld [vmem:[#allocation5] sm:$0xff]  ;;  %v48_v17 = vld [vmem:[#allocation5 + $0x8] sm:$0xff]  ;;  %s79_s1 = sshll.u32 %s173_s0, 4  ;;  %s80_s1 = int_to_ptr.vmem [resolvable:$true] %s79_s1 }
  0x1e   :  { %97 = vlog2.f32 %v46_v1  ;;  %s143_s21 = scalar_lea.vmem %s80_s1, 128  ;;  %p148_p11 = scmp.lt.s32.totalorder %s80_s1, %s80_s1 }
  0x1f   :  { %99 = vlog2.f32 %v55_v2  ;;  %p144_p10 = scmp.ne.s32.totalorder %s80_s1, %s143_s21  ;;  %p149_p12 = scmp.lt.s32.totalorder %s143_s21, %s143_s21 }
  0x20   :  { %101 = vlog2.f32 %v56_v3 }
  0x21   :  { %p150_p13 = por %p149_p12, %p148_p11 }
  0x23   :  { %p151_p0 = pnand %p150_p13, %p144_p10 }
  0x2a   :  { %v96_v4 = vpop.eup %95 }
  0x2b   :  { %v98_v5 = vpop.eup %97  ;;  %v50_v6 = vmul.f32 0.6931472, %v96_v4 }
  0x2c   :  { %v100_v7 = vpop.eup %99  ;;  %v52_v8 = vmul.f32 0.6931472, %v98_v5 }
  0x2d   :  { %v102_v9 = vpop.eup %101  ;;  %v53_v10 = vmax.f32 %v50_v6, -100.0  ;;  %v58_v11 = vmul.f32 0.6931472, %v100_v7 }
  0x2e   :  { %v54_v12 = vmax.f32 %v52_v8, -100.0  ;;  %v60_v13 = vmul.f32 0.6931472, %v102_v9 }
  0x2f   :  { %v61_v14 = vmax.f32 %v58_v11, -100.0 }
  0x30   :  { %v62_v16 = vmax.f32 %v60_v13, -100.0 }
  0x31   :  { %v63_v18 = vsub.f32 %v53_v10, %v61_v14 }
  0x32   :  { %v64_v19 = vsub.f32 %v54_v12, %v62_v16 }
  0x33   :  { %v65_v20 = vmul.f32 %v63_v18, %v47_v15 }
  0x34   :  { %v66_v21 = vmul.f32 %v64_v19, %v48_v17 }
  0x35   :  { %v67_v22 = vadd.f32 %v65_v20, %v61_v14 }
  0x36   :  { %v68_v23 = vadd.f32 %v66_v21, %v62_v16 }
  0x38   :  { %v70_v24 = vadd.f32 %v68_v23, %v67_v22 }
  0x3a   :  { %72 = vst [vmem:[#allocation7] sm:$0xff] %v70_v24 }
  0x3b   :  { %154 = shalt.err (!%p151_p0)
}
  0x3c   :  { %82 = dma.vmem_to_hbm [thread:$0]  %s80_s1, 128, %s200_s2, [#allocation4]  }
  0x3d   :  { %167 = dma.done.wait [#allocation4], 128  }
  0x3e   :  { %168 = vsyncadd [#allocation4], 4294967168 }
  0x3f   :  { %86 = vsyncpa [#allocation3], 1 }
  0x40   :  { %87 = vsyncpa [#allocation6], 1 }
  0x41   :  { %88 = vsyncpa [#allocation4], 1 }

</bundles_post_ra>
